<compile_context>
chip_gen: v5e
topology: v5e:2x2
jax: 0.10.0
libtpu: 0.0.40
codegen_flags: <defaults>
</compile_context>

<pallas_src>
import functools

import jax
import jax.numpy as jnp
from jax.experimental import pallas as pl
from jax.experimental.pallas import tpu as pltpu


def _vmem_budget_and_limit():
    """Generation-aware (tile VMEM budget, scoped vmem_limit_bytes)."""
    cap = None
    try:
        info = pltpu.get_tpu_info()
        for name in ("vmem_capacity_bytes", "vmem_bytes", "vmem_size_bytes"):
            v = getattr(info, name, None)
            if v:
                cap = int(v)
                break
    except Exception:
        cap = None
    if cap is not None and cap > 96 * 1024 * 1024:
        # v5e / v6e: 128 MiB physical VMEM -> larger tiles, raised scoped limit.
        return 24 * 1024 * 1024, 64 * 1024 * 1024
    # v7x (64 MiB per TensorCore) or unknown chip: stay conservative.
    return 16 * 1024 * 1024, 48 * 1024 * 1024


def _res_conv1d_kernel(x_ref, lh_ref, rh_ref, w1_ref, b1_ref, w2_ref, b2_ref,
                       o_ref, x3_ref, *, d, TL, HB, nJ, res_scale, compute_dtype):
    # x_ref : (1, n_in, TL)      current L tile (channels on sublanes, L on lanes)
    # lh_ref: (1, n_in, HB)      block just left of the tile  (masked when j == 0)
    # rh_ref: (1, n_in, HB)      block just right of the tile (masked when j == nJ-1)
    # w1_ref: (n_state, 3*n_in)  conv1 weights, 3 taps fused along K
    # b1_ref: (n_state, 1)
    # w2_ref: (n_in, n_state)    1x1 conv
    # b2_ref: (n_in, 1)
    # o_ref : (1, n_in, TL)
    # x3_ref: (3*n_in, TL)       persistent VMEM scratch holding the fused-K operand
    j = pl.program_id(1)
    cd = compute_dtype

    x_mid = x_ref[0]                                       # (n_in, TL) f32
    n_in = x_mid.shape[0]
    mid = x_mid.astype(cd)

    # Sequence-boundary zero padding (== Conv1d padding=dilation) via masking of
    # the clamped halo blocks.
    left = jnp.where(j > 0, lh_ref[0][:, HB - d:], 0.0).astype(cd)      # (n_in, d)
    right = jnp.where(j < nJ - 1, rh_ref[0][:, :d], 0.0).astype(cd)     # (n_in, d)

    # Assemble the fused-K operand directly into the VMEM scratch, band by band
    # (no tap0/tap2 + axis-0 concatenate triple materialization).
    # tap k at position t reads x[:, t + (k-1)*d].
    x3_ref[n_in:2 * n_in, :] = mid                                           # tap 1
    x3_ref[0:n_in, :] = jnp.concatenate([left, mid[:, :TL - d]], axis=1)     # tap 0
    x3_ref[2 * n_in:3 * n_in, :] = jnp.concatenate([mid[:, d:], right], axis=1)  # tap 2

    # Conv1d(k=3, dilation=d) as one fused matmul with K = 3*n_in (MXU, f32 accum).
    h = jnp.dot(w1_ref[...], x3_ref[...], preferred_element_type=jnp.float32)
    # Fuse the compute-dtype cast into the ReLU: only one (n_state, TL) buffer live.
    h = jnp.maximum(h + b1_ref[...], 0.0).astype(cd)       # (n_state, TL)

    # Conv1d(k=1) == channel matmul.
    y = jnp.dot(w2_ref[...], h, preferred_element_type=jnp.float32)
    y = jnp.maximum(y + b2_ref[...], 0.0)                  # (n_in, TL)

    # Residual with the exact (f32) input tile.
    o_ref[0] = (x_mid + res_scale * y).astype(o_ref.dtype)


def _res_conv1d_single_kernel(x_ref, w1_ref, b1_ref, w2_ref, b2_ref, o_ref, *,
                              d, res_scale, compute_dtype):
    """Whole-row fallback (rows that cannot be lane-tiled): no halo DMAs,
    zero padding applied in-kernel."""
    cd = compute_dtype
    x_mid = x_ref[0]                                       # (n_in, L) f32
    n_in, L = x_mid.shape
    mid = x_mid.astype(cd)
    zpad = jnp.zeros((n_in, d), dtype=cd)
    tap0 = jnp.concatenate([zpad, mid[:, :L - d]], axis=1)
    tap2 = jnp.concatenate([mid[:, d:], zpad], axis=1)
    x3 = jnp.concatenate([tap0, mid, tap2], axis=0)        # (3*n_in, L)

    h = jnp.dot(w1_ref[...], x3, preferred_element_type=jnp.float32)
    h = jnp.maximum(h + b1_ref[...], 0.0).astype(cd)
    y = jnp.dot(w2_ref[...], h, preferred_element_type=jnp.float32)
    y = jnp.maximum(y + b2_ref[...], 0.0)
    o_ref[0] = (x_mid + res_scale * y).astype(o_ref.dtype)


def _choose_seq_tile(B, L, n_in, n_state, dilation, cb, budget, seq_tile=None):
    """Pick (TL, HB): L-tile width and halo fetch width (both lane-aligned).
    Returns (None, HB) when the row cannot be tiled."""
    HB = 128 * ((dilation + 127) // 128)          # halo block width, >= dilation

    def ok(t):
        return (L % t == 0) and (t % HB == 0) and (t > dilation)

    if seq_tile is not None:
        return (seq_tile, HB) if ok(seq_tile) else (None, HB)

    # Rough per-L-column VMEM bytes: double-buffered f32 in/out + y f32,
    # fused-K scratch + cast temps in compute dtype, h (cd) + f32 dot transient.
    per_col = n_in * (20 + 6 * cb) + n_state * (4 + cb)
    fixed = 4 * n_in * n_state * cb + 16 * n_in * HB      # weights + halo buffers
    cands = [t for t in (4096, 2048, 1024, 512, 256, 128)
             if ok(t) and fixed + per_col * t <= budget]
    if cands:
        # Prefer a grid with >= 2 total steps (v7x megacore / pipeline overlap).
        split = [t for t in cands if B * (L // t) >= 2]
        return (split[0] if split else cands[0]), HB
    for t in (256, 128):                                   # over-budget last resort
        if ok(t):
            return t, HB
    return None, HB


def res_conv1d_block(x, conv1_w, conv1_b, conv2_w, conv2_b, *,
                     dilation=1, res_scale=1.0,
                     compute_dtype=jnp.bfloat16, seq_tile=None):
    """x: (B, n_in, L) float32 (PyTorch NCL).  conv1_w: (n_state, n_in, 3),
    conv1_b: (n_state,), conv2_w: (n_in, n_state, 1) or (n_in, n_state),
    conv2_b: (n_in,).  Returns (B, n_in, L)."""
    B, n_in, L = x.shape
    n_state = conv1_w.shape[0]
    assert conv1_w.shape == (n_state, n_in, 3)
    assert conv2_w.shape[:2] == (n_in, n_state)
    assert 0 < dilation < L

    cd = jnp.dtype(compute_dtype)
    # conv1 weights with the 3 taps fused along K -> one (n_state, 3*n_in) matmul.
    w1f = jnp.transpose(conv1_w, (0, 2, 1)).reshape(n_state, 3 * n_in).astype(cd)
    w2m = conv2_w.reshape(n_in, n_state).astype(cd)
    b1c = conv1_b.reshape(n_state, 1).astype(jnp.float32)
    b2c = conv2_b.reshape(n_in, 1).astype(jnp.float32)

    budget, vmem_limit = _vmem_budget_and_limit()
    TL, HB = _choose_seq_tile(B, L, n_in, n_state, dilation, cd.itemsize,
                              budget, seq_tile)

    if TL is None:
        row_bytes = n_in * L * x.dtype.itemsize
        if (L % 128 != 0) and row_bytes > 4 * 1024 * 1024:
            # Large row that isn't lane-aligned: pad L to a multiple of 128 once in
            # the wrapper and take the tiled path (padded zeros double as the right
            # boundary padding); slice the valid prefix back out.
            Lp = 128 * pl.cdiv(L, 128)
            xp = jnp.pad(x, ((0, 0), (0, 0), (0, Lp - L)))
            out = res_conv1d_block(xp, conv1_w, conv1_b, conv2_w, conv2_b,
                                   dilation=dilation, res_scale=res_scale,
                                   compute_dtype=compute_dtype)
            return out[:, :, :L]

        # Small untileable row: whole-row kernel, no halo DMAs.
        kernel = functools.partial(_res_conv1d_single_kernel, d=dilation,
                                   res_scale=float(res_scale), compute_dtype=cd)
        flops = 8 * B * L * n_in * n_state
        bytes_accessed = (2 * x.size * x.dtype.itemsize
                          + (w1f.size + w2m.size) * cd.itemsize
                          + (n_state + n_in) * 4)
        return pl.pallas_call(
            kernel,
            out_shape=jax.ShapeDtypeStruct((B, n_in, L), x.dtype),
            grid=(B,),
            in_specs=[
                pl.BlockSpec((1, n_in, L), lambda b: (b, 0, 0)),
                pl.BlockSpec((n_state, 3 * n_in), lambda b: (0, 0)),
                pl.BlockSpec((n_state, 1), lambda b: (0, 0)),
                pl.BlockSpec((n_in, n_state), lambda b: (0, 0)),
                pl.BlockSpec((n_in, 1), lambda b: (0, 0)),
            ],
            out_specs=pl.BlockSpec((1, n_in, L), lambda b: (b, 0, 0)),
            compiler_params=pltpu.CompilerParams(
                dimension_semantics=("parallel",),
                vmem_limit_bytes=vmem_limit),
            cost_estimate=pl.CostEstimate(flops=flops, transcendentals=0,
                                          bytes_accessed=bytes_accessed),
        )(x, w1f, b1c, w2m, b2c)

    nJ = L // TL
    r = TL // HB                      # halo blocks per main tile
    last_halo_block = L // HB - 1

    kernel = functools.partial(_res_conv1d_kernel, d=dilation, TL=TL, HB=HB,
                               nJ=nJ, res_scale=float(res_scale), compute_dtype=cd)

    flops = 8 * B * L * n_in * n_state          # 2*(3*n_in + n_in)*n_state MACs/pos
    bytes_accessed = (2 * x.size * x.dtype.itemsize
                      + 2 * B * nJ * n_in * HB * x.dtype.itemsize   # halo re-reads
                      + (w1f.size + w2m.size) * cd.itemsize
                      + (n_state + n_in) * 4)

    out = pl.pallas_call(
        kernel,
        out_shape=jax.ShapeDtypeStruct((B, n_in, L), x.dtype),
        grid=(B, nJ),
        in_specs=[
            # current L tile
            pl.BlockSpec((1, n_in, TL), lambda b, j: (b, 0, j)),
            # left halo block (clamped at the sequence start; masked in-kernel)
            pl.BlockSpec((1, n_in, HB),
                         lambda b, j: (b, 0, jnp.maximum(j * r - 1, 0))),
            # right halo block (clamped at the sequence end; masked in-kernel)
            pl.BlockSpec((1, n_in, HB),
                         lambda b, j: (b, 0, jnp.minimum((j + 1) * r,
                                                         last_halo_block))),
            pl.BlockSpec((n_state, 3 * n_in), lambda b, j: (0, 0)),   # w1 (fused)
            pl.BlockSpec((n_state, 1), lambda b, j: (0, 0)),          # b1
            pl.BlockSpec((n_in, n_state), lambda b, j: (0, 0)),       # w2
            pl.BlockSpec((n_in, 1), lambda b, j: (0, 0)),             # b2
        ],
        out_specs=pl.BlockSpec((1, n_in, TL), lambda b, j: (b, 0, j)),
        scratch_shapes=[pltpu.VMEM((3 * n_in, TL), cd)],   # fused-K operand
        compiler_params=pltpu.CompilerParams(
            dimension_semantics=("parallel", "parallel"),
            vmem_limit_bytes=vmem_limit),
        cost_estimate=pl.CostEstimate(flops=flops, transcendentals=0,
                                      bytes_accessed=bytes_accessed),
    )(x, x, x, w1f, b1c, w2m, b2c)
    return out


def _reference(x, conv1_w, conv1_b, conv2_w, conv2_b, *, dilation, res_scale):
    """Pure-JAX f32 reference of the PyTorch module (NCL layout)."""
    B, n_in, L = x.shape
    d = dilation
    xp = jnp.pad(x, ((0, 0), (0, 0), (d, d)))
    h = sum(jnp.einsum('sc,bcl->bsl', conv1_w[:, :, k],
                       xp[:, :, k * d:k * d + L]) for k in range(3))
    h = jnp.maximum(h + conv1_b[None, :, None], 0.0)
    y = jnp.einsum('cs,bsl->bcl', conv2_w.reshape(n_in, -1), h) + conv2_b[None, :, None]
    y = jnp.maximum(y, 0.0)
    return x + res_scale * y


if __name__ == "__main__":
    key = jax.random.PRNGKey(0)
    kx1, kx2, kw1, kb1, kw2, kb2 = jax.random.split(key, 6)

    def make_params(n_in, n_state, scale=0.1):
        w1 = jax.random.normal(kw1, (n_state, n_in, 3), dtype=jnp.float32) * scale
        b1 = jax.random.normal(kb1, (n_state,), dtype=jnp.float32) * scale
        w2 = jax.random.normal(kw2, (n_in, n_state, 1), dtype=jnp.float32) * scale
        b2 = jax.random.normal(kb2, (n_in,), dtype=jnp.float32) * scale
        return w1, b1, w2, b2

    # Case 1: tiny single-tile (no-halo) path (L=16), f32 MXU -> tight tolerance.
    B, n_in, n_state, L, d, rs = 2, 8, 16, 16, 2, 0.5
    x = jax.random.normal(kx1, (B, n_in, L), dtype=jnp.float32)
    w1, b1, w2, b2 = make_params(n_in, n_state)
    y = jax.block_until_ready(
        res_conv1d_block(x, w1, b1, w2, b2, dilation=d, res_scale=rs,
                         compute_dtype=jnp.float32))
    y_ref = _reference(x, w1, b1, w2, b2, dilation=d, res_scale=rs)
    assert y.shape == (B, n_in, L)
    assert jnp.allclose(y, y_ref, atol=1e-4, rtol=1e-4), "case1 mismatch vs reference"

    # Case 2: multi-tile path (L=384 -> 3 tiles of 128) exercising halos + scratch.
    B, n_in, n_state, L, d, rs = 2, 8, 16, 384, 9, 1.0
    x = jax.random.normal(kx2, (B, n_in, L), dtype=jnp.float32)
    w1, b1, w2, b2 = make_params(n_in, n_state)
    y_ref = _reference(x, w1, b1, w2, b2, dilation=d, res_scale=rs)
    # 2a: f32 MXU -> exact check of the tiling / halo / scratch-band indexing.
    y32 = jax.block_until_ready(
        res_conv1d_block(x, w1, b1, w2, b2, dilation=d, res_scale=rs,
                         compute_dtype=jnp.float32))
    assert jnp.allclose(y32, y_ref, atol=1e-4, rtol=1e-4), "case2 f32 mismatch"
    # 2b: default bf16 MXU fast path -> bf16-level tolerance.
    ybf = jax.block_until_ready(
        res_conv1d_block(x, w1, b1, w2, b2, dilation=d, res_scale=rs))
    assert jnp.allclose(ybf, y_ref, atol=3e-2, rtol=3e-2), "case2 bf16 mismatch"

    print("KERNEL_OK")
</pallas_src>

<mosaic_0001>
module attributes {stable_mosaic.version = 11 : i64} {
  func.func @_res_conv1d_single_kernel(%arg0: i32, %arg1: memref<1x8x16xf32, #tpu.memory_space<vmem>>, %arg2: memref<16x24xf32, #tpu.memory_space<vmem>>, %arg3: memref<16x1xf32, #tpu.memory_space<vmem>>, %arg4: memref<8x16xf32, #tpu.memory_space<vmem>>, %arg5: memref<8x1xf32, #tpu.memory_space<vmem>>, %arg6: memref<1x8x16xf32, #tpu.memory_space<vmem>>) attributes {dimension_semantics = [#tpu.dimension_semantics<parallel>], iteration_bounds = array<i64: 2>, scalar_prefetch = 0 : i64, scratch_operands = 0 : i64, tpu.core_type = #tpu.core_type<tc>, window_params = [{transform_indices = @transform_0, window_bounds = array<i64: 1, 8, 16>}, {pipeline_mode = #tpu.pipeline_mode<synchronous>, transform_indices = @transform_1, window_bounds = array<i64: 16, 24>}, {pipeline_mode = #tpu.pipeline_mode<synchronous>, transform_indices = @transform_2, window_bounds = array<i64: 16, 1>}, {pipeline_mode = #tpu.pipeline_mode<synchronous>, transform_indices = @transform_3, window_bounds = array<i64: 8, 16>}, {pipeline_mode = #tpu.pipeline_mode<synchronous>, transform_indices = @transform_4, window_bounds = array<i64: 8, 1>}, {transform_indices = @transform_5, window_bounds = array<i64: 1, 8, 16>}]} {
    %c0 = arith.constant 0 : index
    %c0_0 = arith.constant 0 : index
    %c0_1 = arith.constant 0 : index
    %0 = vector.load %arg1[%c0, %c0_0, %c0_1] : memref<1x8x16xf32, #tpu.memory_space<vmem>>, vector<1x8x16xf32>
    %1 = vector.shape_cast %0 : vector<1x8x16xf32> to vector<8x16xf32>
    %cst = arith.constant 0.000000e+00 : f32
    %2 = vector.broadcast %cst : f32 to vector<8x2xf32>
    %3 = vector.extract_strided_slice %1 {offsets = [0, 0], sizes = [8, 14], strides = [1, 1]} : vector<8x16xf32> to vector<8x14xf32>
    %4 = tpu.concatenate %2, %3 in 1 : vector<8x2xf32>, vector<8x14xf32> -> vector<8x16xf32>
    %5 = vector.extract_strided_slice %1 {offsets = [0, 2], sizes = [8, 14], strides = [1, 1]} : vector<8x16xf32> to vector<8x14xf32>
    %6 = tpu.concatenate %5, %2 in 1 : vector<8x14xf32>, vector<8x2xf32> -> vector<8x16xf32>
    %7 = tpu.concatenate %4, %1, %6 in 0 : vector<8x16xf32>, vector<8x16xf32>, vector<8x16xf32> -> vector<24x16xf32>
    %c0_2 = arith.constant 0 : index
    %c0_3 = arith.constant 0 : index
    %8 = vector.load %arg2[%c0_2, %c0_3] : memref<16x24xf32, #tpu.memory_space<vmem>>, vector<16x24xf32>
    %cst_4 = arith.constant dense<0.000000e+00> : vector<16x16xf32>
    %9 = tpu.matmul %8, %7, %cst_4 {dimension_numbers = #tpu.dot_dimension_numbers<[1], [0], [0], [1], [0, 0, 1, 1], [], []>} : vector<16x24xf32>, vector<24x16xf32>, vector<16x16xf32> -> vector<16x16xf32>
    %c0_5 = arith.constant 0 : index
    %c0_6 = arith.constant 0 : index
    %10 = vector.load %arg3[%c0_5, %c0_6] : memref<16x1xf32, #tpu.memory_space<vmem>>, vector<16x1xf32>
    %11 = vector.broadcast %10 : vector<16x1xf32> to vector<16x16xf32>
    %12 = arith.addf %9, %11 : vector<16x16xf32>
    %cst_7 = arith.constant 0.000000e+00 : f32
    %13 = vector.broadcast %cst_7 : f32 to vector<16x16xf32>
    %14 = arith.maximumf %12, %13 : vector<16x16xf32>
    %c0_8 = arith.constant 0 : index
    %c0_9 = arith.constant 0 : index
    %15 = vector.load %arg4[%c0_8, %c0_9] : memref<8x16xf32, #tpu.memory_space<vmem>>, vector<8x16xf32>
    %cst_10 = arith.constant dense<0.000000e+00> : vector<8x16xf32>
    %16 = tpu.matmul %15, %14, %cst_10 {dimension_numbers = #tpu.dot_dimension_numbers<[1], [0], [0], [1], [0, 0, 1, 1], [], []>} : vector<8x16xf32>, vector<16x16xf32>, vector<8x16xf32> -> vector<8x16xf32>
    %c0_11 = arith.constant 0 : index
    %c0_12 = arith.constant 0 : index
    %17 = vector.load %arg5[%c0_11, %c0_12] : memref<8x1xf32, #tpu.memory_space<vmem>>, vector<8x1xf32>
    %18 = vector.broadcast %17 : vector<8x1xf32> to vector<8x16xf32>
    %19 = arith.addf %16, %18 : vector<8x16xf32>
    %cst_13 = arith.constant 0.000000e+00 : f32
    %20 = vector.broadcast %cst_13 : f32 to vector<8x16xf32>
    %21 = arith.maximumf %19, %20 : vector<8x16xf32>
    %cst_14 = arith.constant 5.000000e-01 : f32
    %22 = vector.broadcast %cst_14 : f32 to vector<8x16xf32>
    %23 = arith.mulf %22, %21 : vector<8x16xf32>
    %24 = arith.addf %1, %23 : vector<8x16xf32>
    %c0_15 = arith.constant 0 : index
    %c0_16 = arith.constant 0 : index
    %c0_17 = arith.constant 0 : index
    %25 = vector.load %arg6[%c0_15, %c0_16, %c0_17] : memref<1x8x16xf32, #tpu.memory_space<vmem>>, vector<1x8x16xf32>
    %26 = vector.shape_cast %25 : vector<1x8x16xf32> to vector<8x16xf32>
    %27 = vector.shape_cast %24 : vector<8x16xf32> to vector<1x8x16xf32>
    tpu.vector_store %arg6[%c0_15, %c0_16, %c0_17], %27 {strides = array<i32>} : memref<1x8x16xf32, #tpu.memory_space<vmem>>, vector<1x8x16xf32>,
    return
  }
  func.func @transform_0(%arg0: i32) -> (i32, i32, i32) {
    %c0_i32 = arith.constant 0 : i32
    %c0_i32_0 = arith.constant 0 : i32
    %c0_i32_1 = arith.constant 0 : i32
    return %arg0, %c0_i32, %c0_i32_0 : i32, i32, i32
  }
  func.func @transform_1(%arg0: i32) -> (i32, i32) {
    %c0_i32 = arith.constant 0 : i32
    %c0_i32_0 = arith.constant 0 : i32
    %c0_i32_1 = arith.constant 0 : i32
    return %c0_i32, %c0_i32_0 : i32, i32
  }
  func.func @transform_2(%arg0: i32) -> (i32, i32) {
    %c0_i32 = arith.constant 0 : i32
    %c0_i32_0 = arith.constant 0 : i32
    %c0_i32_1 = arith.constant 0 : i32
    return %c0_i32, %c0_i32_0 : i32, i32
  }
  func.func @transform_3(%arg0: i32) -> (i32, i32) {
    %c0_i32 = arith.constant 0 : i32
    %c0_i32_0 = arith.constant 0 : i32
    %c0_i32_1 = arith.constant 0 : i32
    return %c0_i32, %c0_i32_0 : i32, i32
  }
  func.func @transform_4(%arg0: i32) -> (i32, i32) {
    %c0_i32 = arith.constant 0 : i32
    %c0_i32_0 = arith.constant 0 : i32
    %c0_i32_1 = arith.constant 0 : i32
    return %c0_i32, %c0_i32_0 : i32, i32
  }
  func.func @transform_5(%arg0: i32) -> (i32, i32, i32) {
    %c0_i32 = arith.constant 0 : i32
    %c0_i32_0 = arith.constant 0 : i32
    %c0_i32_1 = arith.constant 0 : i32
    return %arg0, %c0_i32, %c0_i32_0 : i32, i32, i32
  }
}

</mosaic_0001>

<bundles_post_ra>
// kernel: tpu_custom_call.1
= control target key start
LH: loop header
LB: loop body
LE: loop exit
PB: predicated region body
PF: predicated region fallthrough
CT: control target
= control target key end

     0   :  { %10 = vsyncpa [#allocation3], 0  ;;  %s739_s0 = inlined_call_operand.vmem [shape: f32[2,8,16], index: 0, kind: input, shape index: {}]   ;;  %s740_s1 = inlined_call_operand.hbm [shape: f32[16,24], index: 1, kind: input, shape index: {}]   ;;  %s741_s2 = inlined_call_operand.vmem [shape: f32[16,1], index: 2, kind: input, shape index: {}]   ;;  %s742_s3 = inlined_call_operand.vmem [shape: f32[8,16], index: 3, kind: input, shape index: {}]   ;;  %s743_s4 = inlined_call_operand.vmem [shape: f32[8,1], index: 4, kind: input, shape index: {}]   ;;  %s744_s5 = inlined_call_operand.hbm [shape: f32[2,8,16], index: 5, kind: output, shape index: {}]  }
   0x1   :  { %11 = vsyncpa [#allocation4], 0 }
   0x2   :  { %13 = vsyncpa [#allocation4 + $0x1], 0  ;;  %s630_s18 = smov 0   ;;  %s632_s19 = smov 0  }
   0x3   :  { %s634_s20 = smov 0   ;;  %s636_s21 = smov 0  }
   0x4 LB: > { %s651_s22 = sadd.s32 4294967295, %s592_s21   ;;  %s417_s23 = sadd.s32 4294967294, %s592_s21   ;;  %s592_s21 = sphi %s636_s21, %s750_s21   ;;  %s588_s20 = sphi %s634_s20, %s749_s20   ;;  %s584_s19 = sphi %s632_s19, %s748_s19   ;;  %s580_s18 = sphi %s630_s18, %s747_s18  }
   0x5   : > { %s655_s24 = sadd.s32 1, %s592_s21   ;;  %s136_s25 = sadd.s32 1, %s588_s20 }
   0x6   : > { %s133_s26 = ssub.s32 %s592_s21, %s655_s24  ;;  %p146_p0 = scmp.ne.s32.totalorder %s588_s20, %s584_s19 }
   0x7   : > { %p134_p1 = scmp.eq.s32.totalorder %s133_s26, 0  ;;  %p147_p2 = scmp.eq.s32.totalorder %s651_s22, 1 }
   0x8   : > { %p152_p3 = scmp.ne.s32.totalorder %s584_s19, %s580_s18  ;;  %p153_p4 = scmp.eq.s32.totalorder %s417_s23, 1 }
   0x9   : > { %s666_s27 = scalar_select %p134_p1, %s588_s20, %s136_s25  }
   0xa   : > { %p668_p5 = por %p147_p2, %p146_p0  ;;  %p672_p6 = por %p153_p4, %p152_p3 }
   0xb   : > { %p418_p7 = scmp.ge.s32.totalorder %s592_s21, 1  ;;  %p160_p8 = scmp.lt.s32.totalorder %s592_s21, 3 }
   0xc   : > { %p452_p9 = scmp.eq.s32.totalorder %s651_s22, 0  ;;  %s171_s7 = sshll.u32 %s740_s1, 4  ;;  %s172_s7 = int_to_ptr.hbm [resolvable:$true] %s171_s7 }
   0xd   : > { %p161_p10 = pnand %p418_p7, %p160_p8  ;;  %s594_s8 = smov [#allocation2]  }
   0xe   : > { %s173_s9 = sshll.u32 %s594_s8, 4  ;;  %s595_s10 = smov 128   ;;  %s174_s9 = int_to_ptr.vmem [resolvable:$true] %s173_s9 }
   0xf   : > { %p444_p11 = pneg %p161_p10  ;;  %s596_s11 = smov 8  }
  0x10   : > { %205 = sbr.rel (%p161_p10) target bundleno = 429 (0x1ad), region = 40 }
  0x11   : > { %p445_p12 = pnand %p452_p9, %p444_p11 }
  0x13   : > { %447 = dma.hbm_to_vmem [thread:$0]  (!%p445_p12), %s172_s7, 256, %s174_s9, [#allocation3], %s595_s10, %s595_s10, %s596_s11  }
  0x15   : > { %571 = dma.done.wait (%p452_p9), [#allocation3], 256  }
  0x16   : > { %573 = vsyncadd (%p452_p9), [#allocation3], 4294967040  ;;  %p233_p13 = scmp.lt.s32.totalorder %s651_s22, 1  ;;  %s597_s17 = smov 126   ;;  %v252_v1 = vld [vmem:[%s741_s2 + $0x8] sm:$0xff]  ;;  %v599_v2 = vmov 0  }
  0x17   : > { %s598_s23 = smov 2   ;;  %493 = vset.pattern.permute.xlu1 %v599_v2  ;;  %494 = vset.pattern.permute.xlu2 %v599_v2  ;;  %v251_v3 = vld [vmem:[%s741_s2] sm:$0xff]  ;;  %vm247_vm0 = vcmask 113664   ;;  %vm242_vm1 = vcmask 15360   ;;  %vm263_vm3 = vcmask 195584   ;;  %v250_v6 = vld [vmem:[#allocation2 + $0x8] sm:$0xff] }
  0x18   : > { %s234_s12 = scalar_select %p233_p13, %s651_s22, 1  ;;  %260 = vperm.xlu1 %493, %v252_v1   ;;  %495 = vset.pattern.permute.xlu0 %v599_v2  ;;  %vm426_vm2 = vmneg %vm242_vm1  ;;  %v249_v5 = vld [vmem:[#allocation2] sm:$0xff]  ;;  %vm302_vm4 = vcmask 130048  }
  0x19   : > { %v296_v8 = vld [vmem:[%s743_s4] sm:$0xff]  ;;  %s230_s11 = sand.u32 1, %s584_s19   ;;  %s546_s8 = scalar_lea.hbm %s744_s5, 16 }
  0x1a   : > { %s424_s13 = sshll.u32 %s234_s12, 3  ;;  %299 = vperm.xlu2 %494, %v296_v8   ;;  %v295_v17 = vld [vmem:[%s742_s3] sm:$0xff]  ;;  %s423_s12 = sshll.u32 %s230_s11, 3 }
  0x1b   : > { %s236_s16 = scalar_lea.vmem %s739_s0, %s424_s13  ;;  %s432_s13 = sshll.u32 %s651_s22, 3 }
  0x1c   : > { %v237_v0 = vld [vmem:[%s236_s16] sm:$0xff]  ;;  %s341_s16 = scalar_lea.hbm %s744_s5, %s432_s13  ;;  %s331_s26 = scalar_lea.sflag [#allocation4], %s230_s11 }
  0x1d   : > { %244 = vrot.lane.b32.xlu0 %v237_v0, %s597_s17  ;;  %s232_s17 = scalar_lea.vmem [#allocation5], %s423_s12  ;;  %s345_s25 = sshll.u32 %s341_s16, 4  ;;  %s346_s25 = int_to_ptr.hbm [resolvable:$true] %s345_s25 }
  0x1e   : > { %s540_s30 = sshra.s32 %s346_s25, 4  ;;  %s541_s30 = int_to_ptr.hbm [resolvable:$true] %s540_s30 }
  0x1f   : > { %s542_s22 = scalar_lea.hbm %s541_s30, 8  ;;  %p547_p3 = scmp.lt.s32.totalorder %s541_s30, %s744_s5 }
  0x20   : > { %255 = vperm.xlu1 %493, %v251_v3   ;;  %p543_p0 = scmp.ne.s32.totalorder %s541_s30, %s542_s22  ;;  %p548_p4 = scmp.lt.s32.totalorder %s546_s8, %s542_s22 }
  0x22   : > { %p544_p1 = pnand %p543_p0, %p668_p5  ;;  %p549_p7 = por %p548_p4, %p547_p3 }
  0x24   : > { %p545_p2 = pneg %p544_p1 }
  0x25   : > { %239 = vrot.lane.b32.xlu0 %v237_v0, %s598_s23  ;;  %s343_s23 = sshll.u32 %s232_s17, 4  ;;  %s344_s23 = int_to_ptr.vmem [resolvable:$true] %s343_s23 }
  0x26   : > { %p550_p8 = pnand %p549_p7, %p545_p2 }
  0x74   : > { %v300_v18 = vpop.permute.xlu2 %299 }
  0x8a   : > { %v261_v9 = vpop.permute.xlu1 %260 }
  0x8f   : > { %v245_v4 = vpop.permute.xlu0 %244 }
  0x90   : > { %425 = vmatpush.msk.msra.mxu0 %vm247_vm0, %v245_v4  ;;  %435 = vmatpush.msk.msra.mxu2 %vm247_vm0, %v245_v4 }
  0x92   : > { %284 = vmatpush.msra.mxu0 %v237_v0  ;;  %436 = vmatpush.msra.mxu2 %v237_v0  ;;  %v256_v10 = vpop.permute.xlu1 %255 }
  0x97   : > { %v240_v7 = vpop.permute.xlu0 %239 }
  0x98   : > { %427 = vmatpush.msk.msra.mxu0 %vm426_vm2, %v240_v7  ;;  %437 = vmatpush.msk.msra.mxu2 %vm426_vm2, %v240_v7 }
  0x99   : > { %428 = vmatmul.msk.f32.vlgmr.msra.gmra.mxu0 %vm263_vm3, %v249_v5  ;;  %429 = vmatmul.msk.f32.vlgmr.msra.gmra.mxu2 %vm263_vm3, %v250_v6 }
 0x116   : > { %v287_v11 = vpop.f32.mrf.mxu0 }
 0x117   : > { %v288_v13 = vadd.f32 %v287_v11, %v256_v10 }
 0x119   : > { %v293_v16 = vmax.f32 %v288_v13, 0.0 }
 0x11c   : > { %v290_v12 = vpop.f32.mrf.mxu2 }
 0x11d   : > { %v291_v14 = vadd.f32 %v290_v12, %v261_v9 }
 0x11f   : > { %v294_v15 = vmax.f32 %v291_v14, 0.0 }
 0x121   : > { %320 = vmatpush.msra.mxu1 %v294_v15 }
 0x123   : > { %321 = vmatpush.msra.mxu1 %v293_v16 }
 0x124   : > { %430 = vmatmul.msk.f32.vlgmr.msra.gmra.mxu1 %vm302_vm4, %v295_v17 }
 0x1a1   : > { %v323_v19 = vpop.f32.mrf.mxu1 }
 0x1a2   : > { %v324_v20 = vadd.f32 %v323_v19, %v300_v18 }
 0x1a4   : > { %v326_v21 = vmax.f32 %v324_v20, 0.0 }
 0x1a6   : > { %v327_v22 = vmul.f32 0.5, %v326_v21 }
 0x1a8   : > { %v328_v23 = vadd.f32 %v327_v22, %v237_v0 }
 0x1aa   : > { %329 = vst.msk [vmem:[%s232_s17] sm:$0xff] %vm302_vm4, %v328_v23 }
 0x1ab   : > { %553 = shalt.err (!%p550_p8)
}
 0x1ac   : > { %442 = dma.vmem_to_hbm [thread:$0]  (%p668_p5), %s344_s23, 128, %s346_s25, %s331_s26  }
 0x1ad PF: > { %p454_p9 = scmp.ge.s32.totalorder %s592_s21, 2  ;;  %s357_s11 = sand.u32 1, %s580_s18  }
 0x1ae   : > { %s358_s12 = scalar_lea.sflag [#allocation4], %s357_s11 }
 0x1af   : > { %p449_p10 = pnand %p454_p9, %p672_p6 }
 0x1b1   : > { %p450_p11 = pneg %p449_p10 }
 0x1b3   : > { %575 = dma.done.wait (%p450_p11), %s358_s12, 128  }
 0x1b4   : > { %577 = vsyncadd (%p450_p11), %s358_s12, 4294967168  ;;  %p16_p12 = scmp.ge.s32.totalorder %s655_s24, 4   ;;  %s747_s18 = smov %s584_s19 }
 0x1b5   : > { %s748_s19 = smov %s588_s20  ;;  %s749_s20 = smov %s666_s27 }
 0x1b6   : > { %s750_s21 = smov %s655_s24  ;;  %18 = sbr.rel (!%p16_p12) target bundleno = 4 (0x4), region = 80 }
 0x1bb   :  { %364 = vsyncpa [#allocation3], 1 }
 0x1bc   :  { %366 = vsyncpa [#allocation3 + $0x1], 1 }
 0x1bd   :  { %367 = vsyncpa [#allocation4], 1 }
 0x1be   :  { %369 = vsyncpa [#allocation4 + $0x1], 1 }

</bundles_post_ra>
